<compile_context>
chip_gen: v5e
topology: v5e:2x2
jax: 0.10.0
libtpu: 0.0.40
codegen_flags: <defaults>
</compile_context>

<pallas_src>
import functools

import jax
import jax.numpy as jnp
from jax.experimental import pallas as pl
from jax.experimental.pallas import tpu as pltpu

_LANE = 128


# ----------------------------- Pallas kernel --------------------------------
def _policy_mlp_kernel(obs_ref, blob_ref, mean_ref, *, hidden_pad, bias_rows):
    """Fused 2-hidden-layer tanh MLP, mean head only.

    obs_ref : [B, d_obs_pad]   f32 (d_obs_pad is sublane-pack aligned)
    blob_ref: [d_obs_pad + 2*hidden_pad + bias_rows, P]   (bf16 or f32)
              rows:  w1 | w2 | wmu | biases(b1,b2,bmu,0...)
    mean_ref: [B, output_size] f32
    """
    d_obs = obs_ref.shape[1]
    out_w = mean_ref.shape[1]
    wdt = blob_ref.dtype

    # Static, tile-aligned row slices of the packed blob (zero runtime cost).
    w1 = blob_ref[0:d_obs, :]                                       # [d_obs, P]
    w2 = blob_ref[d_obs:d_obs + hidden_pad, :]                      # [Hp, P]
    wmu = blob_ref[d_obs + hidden_pad:d_obs + 2 * hidden_pad, :]    # [Hp, P]
    bias_off = d_obs + 2 * hidden_pad
    bias = blob_ref[bias_off:bias_off + bias_rows, :].astype(jnp.float32)
    b1 = bias[0:1, :]
    b2 = bias[1:2, :]
    bmu = bias[2:3, :]

    # MXU matmuls take bf16 (or f32) operands with f32 accumulation;
    # bias add + tanh stay f32 (VPU/EUP f32 path works on all generations).
    obs = obs_ref[...].astype(wdt)
    h1 = jnp.tanh(jnp.dot(obs, w1, preferred_element_type=jnp.float32) + b1)
    # Padded lanes of h1/h2 (>= hidden) are exactly 0, so contracting only the
    # first hidden_pad lanes against the unpadded-row w2/wmu is exact.
    h2 = jnp.tanh(
        jnp.dot(h1[:, :hidden_pad].astype(wdt), w2,
                preferred_element_type=jnp.float32) + b2)
    out = jnp.dot(h2[:, :hidden_pad].astype(wdt), wmu,
                  preferred_element_type=jnp.float32) + bmu
    mean_ref[...] = out[:, :out_w].astype(mean_ref.dtype)


# ------------------------------ parameters -----------------------------------
def make_policy_params(obs_dim, hidden, output_size, key):
    """Deterministic synthetic policy parameters (torch-style two-headed actor).

    The logstd head (wls/bls) exists on the policy but is discarded by
    KartingBrain, so it is never packed into / computed by the kernel.
    """
    ks = jax.random.split(key, 8)
    scale1 = 1.0 / jnp.sqrt(obs_dim)
    scale2 = 1.0 / jnp.sqrt(hidden)
    return dict(
        w1=jax.random.uniform(ks[0], (obs_dim, hidden), jnp.float32, -scale1, scale1),
        b1=jax.random.uniform(ks[1], (1, hidden), jnp.float32, -scale1, scale1),
        w2=jax.random.uniform(ks[2], (hidden, hidden), jnp.float32, -scale2, scale2),
        b2=jax.random.uniform(ks[3], (1, hidden), jnp.float32, -scale2, scale2),
        wmu=jax.random.uniform(ks[4], (hidden, output_size), jnp.float32, -scale2, scale2),
        bmu=jax.random.uniform(ks[5], (1, output_size), jnp.float32, -scale2, scale2),
        # Unused by KartingBrain (logstd discarded) -> not packed, not computed.
        wls=jax.random.uniform(ks[6], (hidden, output_size), jnp.float32, -scale2, scale2),
        bls=jax.random.uniform(ks[7], (1, output_size), jnp.float32, -scale2, scale2),
    )


def pack_policy_params(params, weight_dtype=jnp.bfloat16):
    """Pack mean-path weights + biases into ONE lane-dense blob.

    Row layout (all offsets multiples of the dtype sublane pack, so every
    in-kernel slice is tile-aligned):
        [0                , d_obs_pad)                     w1   (cols >= hidden zeroed)
        [d_obs_pad        , d_obs_pad +   hidden_pad)      w2
        [d_obs_pad + Hp   , d_obs_pad + 2*hidden_pad)      wmu  (cols >= output zeroed)
        [d_obs_pad + 2*Hp , + bias_rows)                   b1, b2, bmu, 0...
    Zero padding is a mathematical no-op (tanh(0)=0; padded columns sliced off).
    """
    obs_dim, hidden = params["w1"].shape
    output_size = params["wmu"].shape[1]
    itemsize = jnp.dtype(weight_dtype).itemsize
    pack = 8 * (4 // itemsize)                 # sublane pack: 8 (f32) / 16 (bf16)
    p = _LANE * pl.cdiv(max(hidden, output_size), _LANE)
    d_obs_pad = pack * pl.cdiv(obs_dim, pack)
    hidden_pad = pack * pl.cdiv(hidden, pack)
    bias_rows = pack

    def pad2d(a, rows, cols):
        out = jnp.zeros((rows, cols), jnp.float32)
        return out.at[: a.shape[0], : a.shape[1]].set(a)

    bias_block = jnp.concatenate(
        [pad2d(params["b1"], 1, p),
         pad2d(params["b2"], 1, p),
         pad2d(params["bmu"], 1, p),
         jnp.zeros((bias_rows - 3, p), jnp.float32)],
        axis=0,
    )
    blob = jnp.concatenate(
        [pad2d(params["w1"], d_obs_pad, p),
         pad2d(params["w2"], hidden_pad, p),
         pad2d(params["wmu"], hidden_pad, p),
         bias_block],
        axis=0,
    ).astype(weight_dtype)                      # [d_obs_pad + 2*Hp + bias_rows, P]

    meta = dict(p=p, d_obs_pad=d_obs_pad, hidden_pad=hidden_pad,
                bias_rows=bias_rows, output_size=output_size)
    return blob, meta


def _choose_batch_tile(batch):
    """Batch-grid tile, or None for the gridless (single-tile) path."""
    for tb in (512, 256, 128, 64, 32, 16, 8):
        if batch > tb and batch % tb == 0:
            return tb
    return None


# ------------------------------- forward --------------------------------------
def make_karting_brain(params, output_size, weight_dtype=jnp.bfloat16):
    """Build a forward fn mirroring KartingBrain.forward."""
    blob, meta = pack_policy_params(params, weight_dtype)
    p = meta["p"]
    d_obs_pad = meta["d_obs_pad"]
    hidden_pad = meta["hidden_pad"]
    bias_rows = meta["bias_rows"]

    # Constant "parameters" of KartingBrain (non-trainable torch buffers),
    # materialized once — not on the per-call path.
    output_shape_c = jnp.array([float(output_size)], jnp.float32)
    version_c = jnp.array([3.0], jnp.float32)
    memory_c = jnp.array([0.0], jnp.float32)

    kernel = functools.partial(_policy_mlp_kernel,
                               hidden_pad=hidden_pad, bias_rows=bias_rows)
    vmem = pl.BlockSpec(memory_space=pltpu.MemorySpace.VMEM)

    @jax.jit
    def _mean_fn(observation):
        batch, d_obs = observation.shape
        if d_obs != d_obs_pad:                       # no-op when already aligned
            observation = jnp.pad(observation, ((0, 0), (0, d_obs_pad - d_obs)))

        cost = pl.CostEstimate(
            flops=2 * batch * (d_obs_pad * p + 2 * hidden_pad * p),
            transcendentals=2 * batch * p,
            bytes_accessed=(observation.size * 4
                            + blob.size * blob.dtype.itemsize
                            + batch * output_size * 4),
        )
        out_shape = jax.ShapeDtypeStruct((batch, output_size), jnp.float32)

        tb = _choose_batch_tile(batch)
        if tb is None:
            # Whole problem is a handful of vregs: gridless, everything in VMEM.
            return pl.pallas_call(
                kernel,
                out_shape=out_shape,
                in_specs=[vmem, vmem],
                out_specs=vmem,
                cost_estimate=cost,
            )(observation, blob)

        # Large batch: grid over batch rows; weight blob stays VMEM-resident
        # (index_map constant), obs/mean tiles are double-buffered; "parallel"
        # shards the axis across TensorCores (2x on v7x).
        return pl.pallas_call(
            kernel,
            out_shape=out_shape,
            grid_spec=pltpu.PrefetchScalarGridSpec(
                num_scalar_prefetch=0,
                grid=(batch // tb,),
                in_specs=[pl.BlockSpec((tb, d_obs_pad), lambda i: (i, 0)),
                          pl.BlockSpec(blob.shape, lambda i: (0, 0))],
                out_specs=pl.BlockSpec((tb, output_size), lambda i: (i, 0)),
            ),
            compiler_params=pltpu.CompilerParams(
                dimension_semantics=("parallel",)),
            cost_estimate=cost,
        )(observation, blob)

    def forward(observation):
        return _mean_fn(observation), output_shape_c, version_c, memory_c

    return forward


# ------------------------------- references -----------------------------------
def _reference_forward(observation, params):
    """Pure-f32 reference of the original torch policy's mean path."""
    h1 = jnp.tanh(observation @ params["w1"] + params["b1"])
    h2 = jnp.tanh(h1 @ params["w2"] + params["b2"])
    return h2 @ params["wmu"] + params["bmu"]


def _reference_forward_mixed(observation, params, weight_dtype):
    """Reference matching the kernel's mixed-precision recipe exactly:
    params stored in weight_dtype, MXU operands cast to it, f32 accumulation,
    bias add + tanh in f32."""
    q = lambda a: a.astype(weight_dtype)
    f32 = lambda a: a.astype(jnp.float32)

    def mm(x, w):
        return jnp.dot(q(x), q(w), preferred_element_type=jnp.float32)

    h1 = jnp.tanh(mm(observation, params["w1"]) + f32(q(params["b1"])))
    h2 = jnp.tanh(mm(h1, params["w2"]) + f32(q(params["b2"])))
    return mm(h2, params["wmu"]) + f32(q(params["bmu"]))


if __name__ == "__main__":
    batch, obs_dim, hidden, output_size = 8, 16, 32, 8

    key = jax.random.PRNGKey(0)
    k_obs, k_params = jax.random.split(key)
    observation = jax.random.normal(k_obs, (batch, obs_dim), dtype=jnp.float32)
    params = make_policy_params(obs_dim, hidden, output_size, k_params)

    brain = make_karting_brain(params, output_size, weight_dtype=jnp.bfloat16)
    mean, out_shape, version, mem = jax.block_until_ready(brain(observation))

    # Tight check against a reference using the kernel's exact precision recipe.
    ref_mixed = _reference_forward_mixed(observation, params, jnp.bfloat16)
    # Loose check against the original full-f32 policy (bf16 weight quantization
    # introduces only ~1e-2-level differences at these scales).
    ref_f32 = _reference_forward(observation, params)

    assert mean.shape == (batch, output_size)
    assert mean.dtype == jnp.float32
    assert jnp.allclose(mean, ref_mixed, atol=1e-3, rtol=1e-3), (
        f"max mixed-ref err {float(jnp.max(jnp.abs(mean - ref_mixed)))}")
    assert jnp.allclose(mean, ref_f32, atol=1e-1), (
        f"max f32-ref err {float(jnp.max(jnp.abs(mean - ref_f32)))}")
    assert out_shape.shape == (1,) and float(out_shape[0]) == float(output_size)
    assert float(version[0]) == 3.0 and float(mem[0]) == 0.0

    print("KERNEL_OK")
</pallas_src>

<mosaic_0001>
module attributes {stable_mosaic.version = 11 : i64} {
  func.func @_policy_mlp_kernel(%arg0: memref<8x16xf32, #tpu.memory_space<vmem>>, %arg1: memref<96x128xbf16, #tpu.memory_space<vmem>>, %arg2: memref<8x8xf32, #tpu.memory_space<vmem>>) attributes {dimension_semantics = [], scalar_prefetch = 0 : i64, scratch_operands = 0 : i64, tpu.core_type = #tpu.core_type<tc>} {
    %c0 = arith.constant 0 : index
    %c0_0 = arith.constant 0 : index
    %0 = vector.load %arg1[%c0, %c0_0] : memref<96x128xbf16, #tpu.memory_space<vmem>>, vector<16x128xbf16>
    %c16 = arith.constant 16 : index
    %c0_1 = arith.constant 0 : index
    %1 = vector.load %arg1[%c16, %c0_1] : memref<96x128xbf16, #tpu.memory_space<vmem>>, vector<32x128xbf16>
    %c48 = arith.constant 48 : index
    %c0_2 = arith.constant 0 : index
    %2 = vector.load %arg1[%c48, %c0_2] : memref<96x128xbf16, #tpu.memory_space<vmem>>, vector<32x128xbf16>
    %c80 = arith.constant 80 : index
    %c0_3 = arith.constant 0 : index
    %3 = vector.load %arg1[%c80, %c0_3] : memref<96x128xbf16, #tpu.memory_space<vmem>>, vector<16x128xbf16>
    %4 = arith.extf %3 : vector<16x128xbf16> to vector<16x128xf32>
    %5 = vector.extract_strided_slice %4 {offsets = [0, 0], sizes = [1, 128], strides = [1, 1]} : vector<16x128xf32> to vector<1x128xf32>
    %6 = vector.extract_strided_slice %4 {offsets = [1, 0], sizes = [1, 128], strides = [1, 1]} : vector<16x128xf32> to vector<1x128xf32>
    %7 = vector.extract_strided_slice %4 {offsets = [2, 0], sizes = [1, 128], strides = [1, 1]} : vector<16x128xf32> to vector<1x128xf32>
    %c0_4 = arith.constant 0 : index
    %c0_5 = arith.constant 0 : index
    %8 = vector.load %arg0[%c0_4, %c0_5] : memref<8x16xf32, #tpu.memory_space<vmem>>, vector<8x16xf32>
    %9 = arith.truncf %8 : vector<8x16xf32> to vector<8x16xbf16>
    %cst = arith.constant dense<0.000000e+00> : vector<8x128xf32>
    %10 = tpu.matmul %9, %0, %cst {dimension_numbers = #tpu.dot_dimension_numbers<[1], [0], [0], [1], [0, 0, 1, 1], [], []>} : vector<8x16xbf16>, vector<16x128xbf16>, vector<8x128xf32> -> vector<8x128xf32>
    %11 = vector.broadcast %5 : vector<1x128xf32> to vector<8x128xf32>
    %12 = arith.addf %10, %11 : vector<8x128xf32>
    %13 = math.tanh %12 : vector<8x128xf32>
    %14 = vector.extract_strided_slice %13 {offsets = [0, 0], sizes = [8, 32], strides = [1, 1]} : vector<8x128xf32> to vector<8x32xf32>
    %15 = arith.truncf %14 : vector<8x32xf32> to vector<8x32xbf16>
    %cst_6 = arith.constant dense<0.000000e+00> : vector<8x128xf32>
    %16 = tpu.matmul %15, %1, %cst_6 {dimension_numbers = #tpu.dot_dimension_numbers<[1], [0], [0], [1], [0, 0, 1, 1], [], []>} : vector<8x32xbf16>, vector<32x128xbf16>, vector<8x128xf32> -> vector<8x128xf32>
    %17 = vector.broadcast %6 : vector<1x128xf32> to vector<8x128xf32>
    %18 = arith.addf %16, %17 : vector<8x128xf32>
    %19 = math.tanh %18 : vector<8x128xf32>
    %20 = vector.extract_strided_slice %19 {offsets = [0, 0], sizes = [8, 32], strides = [1, 1]} : vector<8x128xf32> to vector<8x32xf32>
    %21 = arith.truncf %20 : vector<8x32xf32> to vector<8x32xbf16>
    %cst_7 = arith.constant dense<0.000000e+00> : vector<8x128xf32>
    %22 = tpu.matmul %21, %2, %cst_7 {dimension_numbers = #tpu.dot_dimension_numbers<[1], [0], [0], [1], [0, 0, 1, 1], [], []>} : vector<8x32xbf16>, vector<32x128xbf16>, vector<8x128xf32> -> vector<8x128xf32>
    %23 = vector.broadcast %7 : vector<1x128xf32> to vector<8x128xf32>
    %24 = arith.addf %22, %23 : vector<8x128xf32>
    %25 = vector.extract_strided_slice %24 {offsets = [0, 0], sizes = [8, 8], strides = [1, 1]} : vector<8x128xf32> to vector<8x8xf32>
    %c0_8 = arith.constant 0 : index
    %c0_9 = arith.constant 0 : index
    %26 = vector.load %arg2[%c0_8, %c0_9] : memref<8x8xf32, #tpu.memory_space<vmem>>, vector<8x8xf32>
    tpu.vector_store %arg2[%c0_8, %c0_9], %25 {strides = array<i32>} : memref<8x8xf32, #tpu.memory_space<vmem>>, vector<8x8xf32>,
    return
  }
}

</mosaic_0001>

<bundles_post_ra>
// kernel: _mean_fn.1
= control target key start
LH: loop header
LB: loop body
LE: loop exit
PB: predicated region body
PF: predicated region fallthrough
CT: control target
= control target key end

     0   :  { %7 = vsyncpa [#allocation3], 0  ;;  %s308_s0 = inlined_call_operand.hbm [shape: f32[8,16], index: 0, kind: input, shape index: {}]   ;;  %s309_s1 = inlined_call_operand.hbm [shape: bf16[96,128], index: 1, kind: input, shape index: {}]   ;;  %s310_s2 = inlined_call_operand.hbm [shape: f32[8,8], index: 2, kind: output, shape index: {}]  }
   0x1   :  { %8 = vsyncpa [#allocation6], 0 }
   0x2   :  { %9 = vsyncpa [#allocation4], 0  ;;  %s15_s11 = sshll.u32 %s308_s0, 4  ;;  %s279_s12 = smov [#allocation2]   ;;  %s16_s11 = int_to_ptr.hbm [resolvable:$true] %s15_s11 }
   0x3   :  { %s17_s13 = sshll.u32 %s279_s12, 4  ;;  %s25_s16 = sshll.u32 %s309_s1, 4  ;;  %s18_s13 = int_to_ptr.vmem [resolvable:$true] %s17_s13  ;;  %s26_s16 = int_to_ptr.hbm [resolvable:$true] %s25_s16 }
   0x4   :  { %20 = dma.hbm_to_vmem [thread:$0]  %s16_s11, 128, %s18_s13, [#allocation3]  }
   0x5   :  { %s280_s17 = smov [#allocation5]   ;;  %s281_s19 = smov 64  }
   0x6   :  { %s27_s18 = sshll.u32 %s280_s17, 4  ;;  %s282_s20 = smov 4   ;;  %s28_s18 = int_to_ptr.vmem [resolvable:$true] %s27_s18 }
   0x7   :  { %33 = dma.hbm_to_vmem [thread:$0]  %s26_s16, 768, %s28_s18, [#allocation6], %s281_s19, %s281_s19, %s282_s20  }
   0x8   :  { %273 = dma.done.wait [#allocation3], 128  }
   0x9   :  { %274 = vsyncadd [#allocation3], 4294967168 }
   0xa   :  { %275 = dma.done.wait [#allocation6], 768  }
   0xb   :  { %276 = vsyncadd [#allocation6], 4294966528  ;;  %v187_v0 = vld [vmem:[#allocation5] sm:$0xff]  ;;  %v55_v1 = vld [vmem:[#allocation2] sm:$0xff]  ;;  %vm64_vm0 = vcmask 130048   ;;  %vm96_vm1 = vcmask 261120  }
   0xc   :  { %v56_v2 = vpack.c.bf16 %v55_v1, %v55_v1  ;;  %75 = vmatpush.bf16.msra.mxu0 %v187_v0  ;;  %v189_v3 = vld [vmem:[#allocation5 + $0x10] sm:$0xff]  ;;  %v188_v4 = vld [vmem:[#allocation5 + $0x8] sm:$0xff]  ;;  %v191_v13 = vld [vmem:[#allocation5 + $0x20] sm:$0xff]  ;;  %s283_s0 = smov [#allocation7]   ;;  %s153_s23 = sshll.u32 %s310_s2, 4  ;;  %vm144_vm2 = vcmask 64512   ;;  %s154_s23 = int_to_ptr.hbm [resolvable:$true] %s153_s23 }
   0xd   :  { %106 = vmatpush.bf16.msra.mxu1 %v189_v3  ;;  %v53_v5 = vld [vmem:[#allocation5 + $0x28] sm:$0xf]  ;;  %137 = vmatpush.bf16.msra.mxu2 %v191_v13  ;;  %v190_v14 = vld [vmem:[#allocation5 + $0x18] sm:$0xff]  ;;  %s151_s1 = sshll.u32 %s283_s0, 4  ;;  %s152_s1 = int_to_ptr.vmem [resolvable:$true] %s151_s1 }
   0xe   :  { %v54_v6 = vunpack.c.l.bf16 %v53_v5 }
   0xf   :  { %168 = vmatmul.msk.bf16.vlgmr.msra.gmra.mxu0 %vm64_vm0, %v56_v2 }
  0x10   :  { %v57_v7 = vperm.slane %v54_v6, 0  ;;  %v83_v15 = vperm.slane %v54_v6, 1  ;;  %v115_v21 = vperm.slane %v54_v6, 2 }
  0x11   :  { %107 = vmatpush.bf16.msra.mxu1 %v188_v4  ;;  %138 = vmatpush.bf16.msra.mxu2 %v190_v14 }
  0x8c   :  { %v77_v8 = vpop.f32.mrf.mxu0 }
  0x8d   :  { %v78_v9 = vadd.f32 %v77_v8, %v57_v7 }
  0x8f   :  { %197 = vtanh.f32 %v78_v9 }
  0x94   :  { %v79_v10 = vpop.f32.mrf.mxu0 }
  0x95   :  { %v198_v11 = vpop.eup %197 }
  0x96   :  { %v82_v12 = vpack.c.bf16 %v198_v11, %v198_v11 }
  0x98   :  { %177 = vmatmul.msk.bf16.vlgmr.msra.gmra.mxu1 %vm96_vm1, %v82_v12 }
 0x115   :  { %v109_v16 = vpop.f32.mrf.mxu1 }
 0x116   :  { %v110_v17 = vadd.f32 %v109_v16, %v83_v15 }
 0x118   :  { %199 = vtanh.f32 %v110_v17 }
 0x11d   :  { %v111_v18 = vpop.f32.mrf.mxu1 }
 0x11e   :  { %v200_v19 = vpop.eup %199 }
 0x11f   :  { %v114_v20 = vpack.c.bf16 %v200_v19, %v200_v19 }
 0x121   :  { %186 = vmatmul.msk.bf16.vlgmr.msra.gmra.mxu2 %vm96_vm1, %v114_v20 }
 0x1a4   :  { %v140_v22 = vpop.f32.mrf.mxu2 }
 0x1a5   :  { %v141_v23 = vadd.f32 %v140_v22, %v115_v21 }
 0x1a7   :  { %145 = vst.msk [vmem:[#allocation7] sm:$0xff] %vm144_vm2, %v141_v23 }
 0x1a8   :  { %156 = dma.vmem_to_hbm [thread:$0]  %s152_s1, 128, %s154_s23, [#allocation4]  }
 0x1ac   :  { %v142_v24 = vpop.f32.mrf.mxu2 }
 0x1ad   :  { %277 = dma.done.wait [#allocation4], 128  }
 0x1ae   :  { %278 = vsyncadd [#allocation4], 4294967168 }
 0x1af   :  { %161 = vsyncpa [#allocation3], 1 }
 0x1b0   :  { %162 = vsyncpa [#allocation6], 1 }
 0x1b1   :  { %163 = vsyncpa [#allocation4], 1 }

</bundles_post_ra>
